<compile_context>
chip_gen: v5e
topology: v5e:2x2
jax: 0.10.0
libtpu: 0.0.40
codegen_flags: <defaults>
</compile_context>

<pallas_src>
import math
import functools

import jax
import jax.numpy as jnp
from jax.experimental import pallas as pl
from jax.experimental.pallas import tpu as pltpu


# ---------------------------------------------------------------------------
# Linear layer kernel:  y = x @ W^T + b   (torch Linear weight layout [out, in])
# ---------------------------------------------------------------------------
def _linear_kernel(x_ref, w_ref, b_ref, o_ref):
    acc = jax.lax.dot_general(
        x_ref[...], w_ref[...],
        dimension_numbers=(((1,), (1,)), ((), ())),   # contract K of x with K of W
        preferred_element_type=jnp.float32)
    o_ref[...] = (acc + b_ref[...]).astype(o_ref.dtype)


def pallas_linear(x, w, b):
    """x: [M, K], w: [N, K] (torch layout), b: [N] -> [M, N]."""
    M, K = x.shape
    N = w.shape[0]
    TM = 256 if (M % 256 == 0) else M
    b2 = b.reshape(1, N)
    return pl.pallas_call(
        _linear_kernel,
        out_shape=jax.ShapeDtypeStruct((M, N), x.dtype),
        grid_spec=pltpu.PrefetchScalarGridSpec(
            num_scalar_prefetch=0,
            grid=(M // TM,),
            in_specs=[
                pl.BlockSpec((TM, K), lambda i: (i, 0)),
                pl.BlockSpec((N, K), lambda i: (0, 0)),
                pl.BlockSpec((1, N), lambda i: (0, 0)),
            ],
            out_specs=pl.BlockSpec((TM, N), lambda i: (i, 0)),
        ),
        compiler_params=pltpu.CompilerParams(dimension_semantics=("parallel",)),
    )(x, w, b2)


# ---------------------------------------------------------------------------
# Scaled-dot-product attention kernels (all heads of one batch, one query tile)
# ---------------------------------------------------------------------------
def _attn_core(q, k, v, invalid):
    # q: (H, TQ, dh) already scaled; k, v: (H, S, dh); invalid: (TQ, S) bool or None
    s = jnp.einsum("hqd,hkd->hqk", q, k, preferred_element_type=jnp.float32)
    if invalid is not None:
        s = jnp.where(jnp.broadcast_to(invalid[None, :, :], s.shape),
                      jnp.finfo(jnp.float32).min, s)
    s_max = jnp.max(s, axis=-1, keepdims=True)
    e = jnp.exp(s - s_max)
    denom = jnp.sum(e, axis=-1, keepdims=True)
    w = e * pl.reciprocal(denom, approx=True)          # EUP, essentially free
    o = jnp.einsum("hqk,hkd->hqd", w.astype(v.dtype), v,
                   preferred_element_type=jnp.float32)
    return o, w


def _attn_kernel_masked(q_ref, k_ref, v_ref, m_ref, o_ref, attn_ref, *, scale):
    q = q_ref[0].astype(jnp.float32) * scale            # fold 1/sqrt(d_model) into Q
    o, w = _attn_core(q, k_ref[0], v_ref[0], m_ref[0] == 0)
    attn_ref[0] = w.astype(attn_ref.dtype)
    o_ref[0] = o.astype(o_ref.dtype)


def _attn_kernel_nomask(q_ref, k_ref, v_ref, o_ref, attn_ref, *, scale):
    q = q_ref[0].astype(jnp.float32) * scale
    o, w = _attn_core(q, k_ref[0], v_ref[0], None)
    attn_ref[0] = w.astype(attn_ref.dtype)
    o_ref[0] = o.astype(o_ref.dtype)


def _pick_tq(S):
    # Query-tile size: keep per-step VMEM at O(TQ*S). Full S is always legal.
    for t in (256, 128):
        if S % t == 0:
            return t
    return S


def _attention_call(q4, k4, v4, mask_i8, scale):
    """q4/k4/v4: [B, H, S, dh]; mask_i8: [B, S, S] int8 or None."""
    B, H, S, dh = q4.shape
    TQ = _pick_tq(S)
    n_qt = S // TQ
    dtype = q4.dtype

    q_spec = pl.BlockSpec((1, H, TQ, dh), lambda b, t: (b, 0, t, 0))
    kv_spec = pl.BlockSpec((1, H, S, dh), lambda b, t: (b, 0, 0, 0))
    o_spec = pl.BlockSpec((1, H, TQ, dh), lambda b, t: (b, 0, t, 0))
    a_spec = pl.BlockSpec((1, H, TQ, S), lambda b, t: (b, 0, t, 0))

    out_shape = (
        jax.ShapeDtypeStruct((B, H, S, dh), dtype),
        jax.ShapeDtypeStruct((B, H, S, S), dtype),
    )

    if mask_i8 is None:
        kernel = functools.partial(_attn_kernel_nomask, scale=scale)
        in_specs = [q_spec, kv_spec, kv_spec]
        args = (q4, k4, v4)
    else:
        kernel = functools.partial(_attn_kernel_masked, scale=scale)
        m_spec = pl.BlockSpec((1, TQ, S), lambda b, t: (b, t, 0))
        in_specs = [q_spec, kv_spec, kv_spec, m_spec]
        args = (q4, k4, v4, mask_i8)

    return pl.pallas_call(
        kernel,
        out_shape=out_shape,
        grid_spec=pltpu.PrefetchScalarGridSpec(
            num_scalar_prefetch=0,
            grid=(B, n_qt),
            in_specs=in_specs,
            out_specs=[o_spec, a_spec],
        ),
        compiler_params=pltpu.CompilerParams(
            dimension_semantics=("parallel", "parallel")),
    )(*args)


# ---------------------------------------------------------------------------
# Full MultiheadAttention forward
# ---------------------------------------------------------------------------
def multihead_attention_forward(query, key, value, params, num_heads, mask=None):
    B, S, D = query.shape
    H = num_heads
    dh = D // H
    scale = 1.0 / math.sqrt(D)   # torch module: ScaledDotProductAttention(d_model)

    def proj(x, w, b):
        return pallas_linear(x.reshape(B * S, D), w, b).reshape(B, S, D)

    qp = proj(query, params["wq"], params["bq"])
    kp = proj(key, params["wk"], params["bk"])
    vp = proj(value, params["wv"], params["bv"])

    def split_heads(x):
        return jnp.transpose(x.reshape(B, S, H, dh), (0, 2, 1, 3))   # [B,H,S,dh]

    q4, k4, v4 = split_heads(qp), split_heads(kp), split_heads(vp)

    mask_i8 = None
    if mask is not None:
        # int8 mask: 4x less DMA traffic; broadcast over heads handled by BlockSpec reuse.
        mask_i8 = (jnp.broadcast_to(mask, (B, S, S)) != 0).astype(jnp.int8)

    o4, attn = _attention_call(q4, k4, v4, mask_i8, scale)

    x = jnp.transpose(o4, (0, 2, 1, 3)).reshape(B, S, D)   # concat heads
    x = pallas_linear(x.reshape(B * S, D), params["wo"], params["bo"]).reshape(B, S, D)
    # TODO(synk): torch.nn.Dropout omitted — eval/inference semantics (identity).
    return x, attn


# ---------------------------------------------------------------------------
# Pure-JAX reference (mirrors the torch module exactly) + self-test
# ---------------------------------------------------------------------------
def _reference_mha(q, k, v, params, num_heads, mask):
    B, S, D = q.shape
    H, dh = num_heads, D // num_heads
    factor = math.sqrt(D)

    def lin(x, w, b):
        return jnp.dot(x, w.T) + b

    qp = jnp.transpose(lin(q, params["wq"], params["bq"]).reshape(B, S, H, dh), (0, 2, 1, 3))
    kp = jnp.transpose(lin(k, params["wk"], params["bk"]).reshape(B, S, H, dh), (0, 2, 1, 3))
    vp = jnp.transpose(lin(v, params["wv"], params["bv"]).reshape(B, S, H, dh), (0, 2, 1, 3))

    scores = jnp.einsum("bhqd,bhkd->bhqk", qp, kp) / factor
    if mask is not None:
        scores = jnp.where(mask[:, None, :, :] == 0, jnp.finfo(scores.dtype).min, scores)
    w = jax.nn.softmax(scores, axis=-1)
    x = jnp.einsum("bhqk,bhkd->bhqd", w, vp)
    x = jnp.transpose(x, (0, 2, 1, 3)).reshape(B, S, D)
    x = lin(x, params["wo"], params["bo"])
    return x, w


if __name__ == "__main__":
    B, S, D, H = 2, 8, 32, 4   # batch=2, seq=8, d_model=32, heads=4 (d_head=8)
    key0 = jax.random.PRNGKey(0)
    keys = jax.random.split(key0, 12)

    def w_init(kk):
        return jax.random.normal(kk, (D, D), jnp.float32) * (1.0 / math.sqrt(D))

    def b_init(kk):
        return jax.random.normal(kk, (D,), jnp.float32) * 0.01

    params = {
        "wq": w_init(keys[0]), "bq": b_init(keys[1]),
        "wk": w_init(keys[2]), "bk": b_init(keys[3]),
        "wv": w_init(keys[4]), "bv": b_init(keys[5]),
        "wo": w_init(keys[6]), "bo": b_init(keys[7]),
    }

    q = jax.random.normal(keys[8], (B, S, D), jnp.float32)
    k = jax.random.normal(keys[9], (B, S, D), jnp.float32)
    v = jax.random.normal(keys[10], (B, S, D), jnp.float32)
    # Binary mask with diagonal kept so every row has at least one valid key.
    mask = (jax.random.uniform(keys[11], (B, S, S)) > 0.3).astype(jnp.float32)
    mask = jnp.maximum(mask, jnp.eye(S, dtype=jnp.float32)[None])

    out, attn = multihead_attention_forward(q, k, v, params, H, mask)
    jax.block_until_ready((out, attn))

    ref_out, ref_attn = _reference_mha(q, k, v, params, H, mask)
    assert out.shape == (B, S, D) and attn.shape == (B, H, S, S)
    # Tolerance loosened slightly for pl.reciprocal(approx=True).
    assert jnp.allclose(out, ref_out, atol=1e-2, rtol=1e-2), "out mismatch"
    assert jnp.allclose(attn, ref_attn, atol=1e-2, rtol=1e-2), "attn mismatch"

    # Specialized mask=None path (no mask array materialized or DMA'd).
    out_nm, attn_nm = multihead_attention_forward(q, k, v, params, H, None)
    jax.block_until_ready((out_nm, attn_nm))
    ref_out_nm, ref_attn_nm = _reference_mha(q, k, v, params, H, None)
    assert jnp.allclose(out_nm, ref_out_nm, atol=1e-2, rtol=1e-2)
    assert jnp.allclose(attn_nm, ref_attn_nm, atol=1e-2, rtol=1e-2)

    print("KERNEL_OK")
</pallas_src>

<mosaic_0001>
module attributes {stable_mosaic.version = 11 : i64} {
  func.func @_linear_kernel(%arg0: i32, %arg1: memref<16x32xf32, #tpu.memory_space<vmem>>, %arg2: memref<32x32xf32, #tpu.memory_space<vmem>>, %arg3: memref<1x32xf32, #tpu.memory_space<vmem>>, %arg4: memref<16x32xf32, #tpu.memory_space<vmem>>) attributes {dimension_semantics = [#tpu.dimension_semantics<parallel>], iteration_bounds = array<i64: 1>, scalar_prefetch = 0 : i64, scratch_operands = 0 : i64, tpu.core_type = #tpu.core_type<tc>, window_params = [{transform_indices = @transform_0, window_bounds = array<i64: 16, 32>}, {pipeline_mode = #tpu.pipeline_mode<synchronous>, transform_indices = @transform_1, window_bounds = array<i64: 32, 32>}, {pipeline_mode = #tpu.pipeline_mode<synchronous>, transform_indices = @transform_2, window_bounds = array<i64: 1, 32>}, {transform_indices = @transform_3, window_bounds = array<i64: 16, 32>}]} {
    %c0 = arith.constant 0 : index
    %c0_0 = arith.constant 0 : index
    %0 = vector.load %arg1[%c0, %c0_0] : memref<16x32xf32, #tpu.memory_space<vmem>>, vector<16x32xf32>
    %c0_1 = arith.constant 0 : index
    %c0_2 = arith.constant 0 : index
    %1 = vector.load %arg2[%c0_1, %c0_2] : memref<32x32xf32, #tpu.memory_space<vmem>>, vector<32x32xf32>
    %cst = arith.constant dense<0.000000e+00> : vector<16x32xf32>
    %2 = tpu.matmul %0, %1, %cst {dimension_numbers = #tpu.dot_dimension_numbers<[1], [1], [0], [0], [0, 0, 1, 0], [], []>} : vector<16x32xf32>, vector<32x32xf32>, vector<16x32xf32> -> vector<16x32xf32>
    %c0_3 = arith.constant 0 : index
    %c0_4 = arith.constant 0 : index
    %3 = vector.load %arg3[%c0_3, %c0_4] : memref<1x32xf32, #tpu.memory_space<vmem>>, vector<1x32xf32>
    %4 = vector.broadcast %3 : vector<1x32xf32> to vector<16x32xf32>
    %5 = arith.addf %2, %4 : vector<16x32xf32>
    %c0_5 = arith.constant 0 : index
    %c0_6 = arith.constant 0 : index
    %6 = vector.load %arg4[%c0_5, %c0_6] : memref<16x32xf32, #tpu.memory_space<vmem>>, vector<16x32xf32>
    tpu.vector_store %arg4[%c0_5, %c0_6], %5 {strides = array<i32>} : memref<16x32xf32, #tpu.memory_space<vmem>>, vector<16x32xf32>,
    return
  }
  func.func @transform_0(%arg0: i32) -> (i32, i32) {
    %c0_i32 = arith.constant 0 : i32
    %c0_i32_0 = arith.constant 0 : i32
    return %arg0, %c0_i32 : i32, i32
  }
  func.func @transform_1(%arg0: i32) -> (i32, i32) {
    %c0_i32 = arith.constant 0 : i32
    %c0_i32_0 = arith.constant 0 : i32
    %c0_i32_1 = arith.constant 0 : i32
    return %c0_i32, %c0_i32_0 : i32, i32
  }
  func.func @transform_2(%arg0: i32) -> (i32, i32) {
    %c0_i32 = arith.constant 0 : i32
    %c0_i32_0 = arith.constant 0 : i32
    %c0_i32_1 = arith.constant 0 : i32
    return %c0_i32, %c0_i32_0 : i32, i32
  }
  func.func @transform_3(%arg0: i32) -> (i32, i32) {
    %c0_i32 = arith.constant 0 : i32
    %c0_i32_0 = arith.constant 0 : i32
    return %arg0, %c0_i32 : i32, i32
  }
}

</mosaic_0001>

<bundles_post_ra>
// kernel: tpu_custom_call.1
= control target key start
LH: loop header
LB: loop body
LE: loop exit
PB: predicated region body
PF: predicated region fallthrough
CT: control target
= control target key end

     0   :  { %8 = vsyncpa [#allocation3], 0  ;;  %s273_s0 = inlined_call_operand.hbm [shape: f32[16,32], index: 0, kind: input, shape index: {}]   ;;  %s274_s1 = inlined_call_operand.hbm [shape: f32[32,32], index: 1, kind: input, shape index: {}]   ;;  %s275_s2 = inlined_call_operand.vmem [shape: f32[1,32], index: 2, kind: input, shape index: {}]   ;;  %s276_s3 = inlined_call_operand.hbm [shape: f32[16,32], index: 3, kind: output, shape index: {}]  }
   0x1   :  { %9 = vsyncpa [#allocation6], 0 }
   0x2   :  { %10 = vsyncpa [#allocation4], 0  ;;  %s15_s14 = sshll.u32 %s273_s0, 4  ;;  %s215_s15 = smov [#allocation2]   ;;  %s16_s14 = int_to_ptr.hbm [resolvable:$true] %s15_s14 }
   0x3   :  { %s17_s16 = sshll.u32 %s215_s15, 4  ;;  %s28_s19 = sshll.u32 %s274_s1, 4  ;;  %s18_s16 = int_to_ptr.vmem [resolvable:$true] %s17_s16  ;;  %s29_s19 = int_to_ptr.hbm [resolvable:$true] %s28_s19 }
   0x4   :  { %s216_s20 = smov 128   ;;  %s217_s21 = smov 8  }
   0x5   :  { %23 = dma.hbm_to_vmem [thread:$0]  %s16_s14, 256, %s18_s16, [#allocation3], %s216_s20, %s216_s20, %s217_s21  }
   0x6   :  { %s218_s22 = smov [#allocation5]  }
   0x7   :  { %s30_s23 = sshll.u32 %s218_s22, 4  ;;  %s31_s23 = int_to_ptr.vmem [resolvable:$true] %s30_s23 }
   0x8   :  { %36 = dma.hbm_to_vmem [thread:$0]  %s29_s19, 512, %s31_s23, [#allocation6], %s216_s20, %s216_s20, %s217_s21  }
   0x9   :  { %209 = dma.done.wait [#allocation3], 256  }
   0xa   :  { %210 = vsyncadd [#allocation3], 4294967040 }
   0xb   :  { %211 = dma.done.wait [#allocation6], 512  }
   0xc   :  { %212 = vsyncadd [#allocation6], 4294966784  ;;  %vm57_vm0 = vcmask 261120   ;;  %v52_v0 = vld [vmem:[#allocation5 + $0x18] sm:$0xff]  ;;  %v51_v1 = vld [vmem:[#allocation5 + $0x10] sm:$0xff]  ;;  %s219_s24 = smov [#allocation7]  }
   0xd   :  { %121 = vmatpush.xpose.msk.msra.mxu0 %vm57_vm0, %v52_v0  ;;  %127 = vmatpush.xpose.msk.msra.mxu1 %vm57_vm0, %v52_v0  ;;  %v50_v2 = vld [vmem:[#allocation5 + $0x8] sm:$0xff]  ;;  %v49_v3 = vld [vmem:[#allocation5] sm:$0xff]  ;;  %v47_v4 = vld [vmem:[#allocation2] sm:$0xff]  ;;  %s105_s25 = sshll.u32 %s219_s24, 4  ;;  %s107_s28 = sshll.u32 %s276_s3, 4  ;;  %s106_s25 = int_to_ptr.vmem [resolvable:$true] %s105_s25  ;;  %s108_s28 = int_to_ptr.hbm [resolvable:$true] %s107_s28 }
   0xe   :  { %v48_v5 = vld [vmem:[#allocation2 + $0x8] sm:$0xff]  ;;  %v136_v6 = vld [vmem:[%s275_s2] ss:$0 sm:$0xff] }
  0x11   :  { %122 = vmatpush.xpose.msk.msra.mxu0 %vm57_vm0, %v51_v1  ;;  %128 = vmatpush.xpose.msk.msra.mxu1 %vm57_vm0, %v51_v1 }
  0x15   :  { %123 = vmatpush.xpose.msk.msra.mxu0 %vm57_vm0, %v50_v2  ;;  %129 = vmatpush.xpose.msk.msra.mxu1 %vm57_vm0, %v50_v2 }
  0x19   :  { %124 = vmatpush.xpose.msk.msra.mxu0 %vm57_vm0, %v49_v3  ;;  %130 = vmatpush.xpose.msk.msra.mxu1 %vm57_vm0, %v49_v3 }
  0x1c   :  { %125 = vmatmul.msk.f32.vlgmr.msra.gmra.mxu0 %vm57_vm0, %v47_v4  ;;  %126 = vmatmul.msk.f32.vlgmr.msra.gmra.mxu1 %vm57_vm0, %v48_v5 }
  0x99   :  { %v93_v7 = vpop.f32.mrf.mxu0  ;;  %v96_v8 = vpop.f32.mrf.mxu1 }
  0x9a   :  { %v94_v9 = vadd.f32 %v136_v6, %v93_v7  ;;  %v97_v10 = vadd.f32 %v136_v6, %v96_v8 }
  0x9c   :  { %99 = vst.msk [vmem:[#allocation7] sm:$0xff] %vm57_vm0, %v94_v9 }
  0x9d   :  { %100 = vst.msk [vmem:[#allocation7 + $0x8] sm:$0xff] %vm57_vm0, %v97_v10 }
  0x9e   :  { %113 = dma.vmem_to_hbm [thread:$0]  %s106_s25, 256, %s108_s28, [#allocation4], %s216_s20, %s216_s20, %s217_s21  }
  0x9f   :  { %213 = dma.done.wait [#allocation4], 256  }
  0xa0   :  { %214 = vsyncadd [#allocation4], 4294967040 }
  0xa1   :  { %118 = vsyncpa [#allocation3], 1 }
  0xa2   :  { %119 = vsyncpa [#allocation6], 1 }
  0xa3   :  { %120 = vsyncpa [#allocation4], 1 }

</bundles_post_ra>
